<compile_context>
chip_gen: v6e
topology: v6e:2x2x1
jax: 0.10.0
libtpu: 0.0.40
codegen_flags: <defaults>
</compile_context>

<pallas_src>
import jax
import jax.numpy as jnp
from jax.experimental import pallas as pl
from jax.experimental.pallas import tpu as pltpu


def _round_up(x, m):
    return (x + m - 1) // m * m


def branch_kernel(x_ref, w_ref, b_ref, o_ref):
    # Single MXU matmul with f32 accumulate; bias add (epilogue) stays in f32 on the VPU.
    acc = jnp.dot(x_ref[...], w_ref[...], preferred_element_type=jnp.float32)
    o_ref[...] = (acc + b_ref[...]).astype(o_ref.dtype)


def branch_forward(x, w1, b1, gamma, beta, running_mean, running_var, w2, b2,
                   eps=1e-5, block_m=512, mxu_dtype=jnp.bfloat16):
    """x: (B, input_size) float32. Returns (B, num_outputs) float32 (eval-mode forward)."""
    B, K = x.shape
    O = w2.shape[1]

    # ---- Fold BatchNorm1d (eval) + both Linears into one affine map (exact algebra) ----
    inv_std = 1.0 / jnp.sqrt(running_var + eps)
    scale = gamma * inv_std                                   # (H,)
    shift = beta - running_mean * scale                       # (H,)
    w_eff = (w1 * scale[None, :]) @ w2                        # (K, O)  f32
    b_eff = (b1 * scale + shift) @ w2 + b2                    # (O,)    f32

    # ---- Lane-dense output: pad num_outputs up to a multiple of 128 with zeros ----
    O_pad = _round_up(O, 128)
    w_eff = jnp.pad(w_eff, ((0, 0), (0, O_pad - O)))
    b_eff = jnp.pad(b_eff, (0, O_pad - O))[None, :]           # (1, O_pad) f32

    # ---- Batch tiling: TM multiple of 8 (f32 sublane); pad B to a multiple of TM ----
    TM = block_m if B >= block_m else _round_up(B, 8)
    B_pad = _round_up(B, TM)
    x_pad = jnp.pad(x, ((0, B_pad - B), (0, 0)))

    # bf16 MXU inputs (f32 accumulate inside the kernel); bias stays f32.
    x_pad = x_pad.astype(mxu_dtype)
    w_eff = w_eff.astype(mxu_dtype)

    grid = (B_pad // TM,)
    bytes_accessed = (
        B_pad * K * x_pad.dtype.itemsize          # x
        + K * O_pad * w_eff.dtype.itemsize        # W_eff (resident, read once)
        + O_pad * 4                               # b_eff
        + B_pad * O_pad * 4                       # y
    )
    cost = pl.CostEstimate(flops=2 * B_pad * K * O_pad,
                           transcendentals=0,
                           bytes_accessed=bytes_accessed)

    y_pad = pl.pallas_call(
        branch_kernel,
        out_shape=jax.ShapeDtypeStruct((B_pad, O_pad), jnp.float32),
        grid=grid,
        in_specs=[
            pl.BlockSpec((TM, K), lambda i: (i, 0)),        # x tile, streamed over batch
            pl.BlockSpec((K, O_pad), lambda i: (0, 0)),     # W_eff, VMEM-resident
            pl.BlockSpec((1, O_pad), lambda i: (0, 0)),     # b_eff, VMEM-resident
        ],
        out_specs=pl.BlockSpec((TM, O_pad), lambda i: (i, 0)),
        compiler_params=pltpu.CompilerParams(
            dimension_semantics=("parallel",),
        ),
        cost_estimate=cost,
    )(x_pad, w_eff, b_eff)

    return y_pad[:B, :O]


if __name__ == "__main__":
    # Small shapes consistent with the module.
    batch = 8
    input_size = 32
    hidden_size = 64
    num_outputs = 8

    key = jax.random.PRNGKey(0)
    keys = jax.random.split(key, 8)

    # Deterministic parameter init (synthetic; shapes from the module __init__).
    w1 = jax.random.normal(keys[0], (input_size, hidden_size), jnp.float32) * 0.05
    b1 = jax.random.normal(keys[1], (hidden_size,), jnp.float32) * 0.05
    gamma = 1.0 + 0.1 * jax.random.normal(keys[2], (hidden_size,), jnp.float32)
    beta = 0.1 * jax.random.normal(keys[3], (hidden_size,), jnp.float32)
    running_mean = 0.1 * jax.random.normal(keys[4], (hidden_size,), jnp.float32)
    running_var = 1.0 + 0.1 * jax.random.uniform(keys[5], (hidden_size,), jnp.float32)
    w2 = jax.random.normal(keys[6], (hidden_size, num_outputs), jnp.float32) * 0.05
    b2 = 0.05 * jax.random.normal(keys[7], (num_outputs,), jnp.float32)

    x = jax.random.normal(jax.random.PRNGKey(1), (batch, input_size), jnp.float32)

    out = branch_forward(x, w1, b1, gamma, beta, running_mean, running_var, w2, b2)
    out = jax.block_until_ready(out)

    # Pure-JAX reference check (eval-mode semantics, f32 two-matmul path).
    h_ref = x @ w1 + b1
    h_ref = (h_ref - running_mean) / jnp.sqrt(running_var + 1e-5) * gamma + beta
    ref = h_ref @ w2 + b2
    assert out.shape == (batch, num_outputs)
    # bf16 MXU inputs => looser tolerance than pure-f32.
    assert jnp.allclose(out, ref, atol=2e-2, rtol=2e-2), float(jnp.max(jnp.abs(out - ref)))

    print("KERNEL_OK")
</pallas_src>

<mosaic_0001>
module attributes {stable_mosaic.version = 11 : i64} {
  func.func @branch_kernel(%arg0: i32, %arg1: memref<8x32xbf16, #tpu.memory_space<vmem>>, %arg2: memref<32x128xbf16, #tpu.memory_space<vmem>>, %arg3: memref<1x128xf32, #tpu.memory_space<vmem>>, %arg4: memref<8x128xf32, #tpu.memory_space<vmem>>) attributes {dimension_semantics = [#tpu.dimension_semantics<parallel>], iteration_bounds = array<i64: 1>, scalar_prefetch = 0 : i64, scratch_operands = 0 : i64, tpu.core_type = #tpu.core_type<tc>, window_params = [{transform_indices = @transform_0, window_bounds = array<i64: 8, 32>}, {pipeline_mode = #tpu.pipeline_mode<synchronous>, transform_indices = @transform_1, window_bounds = array<i64: 32, 128>}, {pipeline_mode = #tpu.pipeline_mode<synchronous>, transform_indices = @transform_2, window_bounds = array<i64: 1, 128>}, {transform_indices = @transform_3, window_bounds = array<i64: 8, 128>}]} {
    %c0 = arith.constant 0 : index
    %c0_0 = arith.constant 0 : index
    %0 = vector.load %arg1[%c0, %c0_0] : memref<8x32xbf16, #tpu.memory_space<vmem>>, vector<8x32xbf16>
    %c0_1 = arith.constant 0 : index
    %c0_2 = arith.constant 0 : index
    %1 = vector.load %arg2[%c0_1, %c0_2] : memref<32x128xbf16, #tpu.memory_space<vmem>>, vector<32x128xbf16>
    %cst = arith.constant dense<0.000000e+00> : vector<8x128xf32>
    %2 = tpu.matmul %0, %1, %cst {dimension_numbers = #tpu.dot_dimension_numbers<[1], [0], [0], [1], [0, 0, 1, 1], [], []>} : vector<8x32xbf16>, vector<32x128xbf16>, vector<8x128xf32> -> vector<8x128xf32>
    %c0_3 = arith.constant 0 : index
    %c0_4 = arith.constant 0 : index
    %3 = vector.load %arg3[%c0_3, %c0_4] : memref<1x128xf32, #tpu.memory_space<vmem>>, vector<1x128xf32>
    %4 = vector.broadcast %3 : vector<1x128xf32> to vector<8x128xf32>
    %5 = arith.addf %2, %4 : vector<8x128xf32>
    %c0_5 = arith.constant 0 : index
    %c0_6 = arith.constant 0 : index
    %6 = vector.load %arg4[%c0_5, %c0_6] : memref<8x128xf32, #tpu.memory_space<vmem>>, vector<8x128xf32>
    tpu.vector_store %arg4[%c0_5, %c0_6], %5 {strides = array<i32>} : memref<8x128xf32, #tpu.memory_space<vmem>>, vector<8x128xf32>,
    return
  }
  func.func @transform_0(%arg0: i32) -> (i32, i32) {
    %c0_i32 = arith.constant 0 : i32
    %c0_i32_0 = arith.constant 0 : i32
    return %arg0, %c0_i32 : i32, i32
  }
  func.func @transform_1(%arg0: i32) -> (i32, i32) {
    %c0_i32 = arith.constant 0 : i32
    %c0_i32_0 = arith.constant 0 : i32
    %c0_i32_1 = arith.constant 0 : i32
    return %c0_i32, %c0_i32_0 : i32, i32
  }
  func.func @transform_2(%arg0: i32) -> (i32, i32) {
    %c0_i32 = arith.constant 0 : i32
    %c0_i32_0 = arith.constant 0 : i32
    %c0_i32_1 = arith.constant 0 : i32
    return %c0_i32, %c0_i32_0 : i32, i32
  }
  func.func @transform_3(%arg0: i32) -> (i32, i32) {
    %c0_i32 = arith.constant 0 : i32
    %c0_i32_0 = arith.constant 0 : i32
    return %arg0, %c0_i32 : i32, i32
  }
}

</mosaic_0001>

<bundles_post_ra>
// kernel: tpu_custom_call.1
= control target key start
LH: loop header
LB: loop body
LE: loop exit
PB: predicated region body
PF: predicated region fallthrough
CT: control target
= control target key end

     0   :  { %8 = vsyncpa [#allocation3], 0  ;;  %s256_s0 = inlined_call_operand.hbm [shape: bf16[8,32], index: 0, kind: input, shape index: {}]   ;;  %s257_s1 = inlined_call_operand.hbm [shape: bf16[32,128], index: 1, kind: input, shape index: {}]   ;;  %s258_s2 = inlined_call_operand.vmem [shape: f32[1,128], index: 2, kind: input, shape index: {}]   ;;  %s259_s3 = inlined_call_operand.hbm [shape: f32[8,128], index: 3, kind: output, shape index: {}]  }
   0x1   :  { %9 = vsyncpa [#allocation6], 0 }
   0x2   :  { %10 = vsyncpa [#allocation4], 0  ;;  %s217_s12 = smov [#allocation2]   ;;  %s218_s14 = smov [#allocation5]  }
   0x3   :  { %s17_s13 = sshll.u32 %s217_s12, 4  ;;  %s26_s15 = sshll.u32 %s218_s14, 4  ;;  %s18_s13 = int_to_ptr.vmem [resolvable:$true] %s17_s13  ;;  %s27_s15 = int_to_ptr.vmem [resolvable:$true] %s26_s15 }
   0x4   :  { %s159_s16 = scalar_lea.vmem %s18_s13, 64  ;;  %p164_p1 = scmp.lt.s32.totalorder %s18_s13, %s18_s13 }
   0x5   :  { %p160_p0 = scmp.ne.s32.totalorder %s18_s13, %s159_s16  ;;  %p165_p2 = scmp.lt.s32.totalorder %s159_s16, %s159_s16 }
   0x7   :  { %p166_p3 = por %p165_p2, %p164_p1 }
   0x9   :  { %p167_p4 = pnand %p166_p3, %p160_p0 }
   0xb   :  { %170 = shalt.err (!%p167_p4)
}
   0xc   :  { %20 = dma.hbm_to_vmem [thread:$0]  %s256_s0, 64, %s18_s13, [#allocation3]  }
   0xd   :  { %s179_s19 = scalar_lea.vmem %s27_s15, 256  ;;  %p184_p6 = scmp.lt.s32.totalorder %s27_s15, %s27_s15 }
   0xe   :  { %p180_p5 = scmp.ne.s32.totalorder %s27_s15, %s179_s19  ;;  %p185_p7 = scmp.lt.s32.totalorder %s179_s19, %s179_s19 }
  0x10   :  { %p186_p8 = por %p185_p7, %p184_p6 }
  0x12   :  { %p187_p9 = pnand %p186_p8, %p180_p5 }
  0x14   :  { %190 = shalt.err (!%p187_p9)
}
  0x15   :  { %s219_s20 = smov 64   ;;  %s220_s21 = smov 4  }
  0x16   :  { %32 = dma.hbm_to_vmem [thread:$0]  %s257_s1, 256, %s27_s15, [#allocation6], %s219_s20, %s219_s20, %s220_s21  }
  0x17   :  { %211 = dma.done.wait [#allocation3], 64  }
  0x18   :  { %212 = vsyncadd [#allocation3], 4294967232 }
  0x19   :  { %213 = dma.done.wait [#allocation6], 256  }
  0x1a   :  { %214 = vsyncadd [#allocation6], 4294967040  ;;  %v221_v0 = vmov 0.0   ;;  %vm222_vm0 = vmmov 0   ;;  %v149_v1 = vld [vmem:[#allocation5 + $0x8] sm:$0xff]   ;;  %v150_v2 = vld [vmem:[#allocation5] sm:$0xff]  }
  0x1b   :  { %134 = vmatprep.subr.bf16.mxu0 %v221_v0  ;;  %138 = vmatprep.mubr.msk.bf16.mxu0 %vm222_vm0, %v221_v0  ;;  %v42_v3 = vld [vmem:[#allocation2] sm:$0xf]  ;;  %vm66_vm1 = vcmask 261120   ;;  %s223_s1 = smov [#allocation7]  }
  0x1c   :  { %135 = vmatpush3.bf16.msra.mxu0 %v149_v1  ;;  %v127_v4 = vld [vmem:[%s258_s2] ss:$0 sm:$0xff]  ;;  %s117_s25 = sshll.u32 %s223_s1, 4  ;;  %s118_s25 = int_to_ptr.vmem [resolvable:$true] %s117_s25 }
  0x1d   :  { %136 = vmatprep.subr.bf16.mxu0 %v221_v0  ;;  %s191_s26 = scalar_lea.vmem %s118_s25, 128  ;;  %p196_p11 = scmp.lt.s32.totalorder %s118_s25, %s118_s25 }
  0x1e   :  { %p192_p10 = scmp.ne.s32.totalorder %s118_s25, %s191_s26  ;;  %p197_p12 = scmp.lt.s32.totalorder %s191_s26, %s191_s26 }
  0x20   :  { %137 = vmatpush3.bf16.msra.mxu0 %v150_v2  ;;  %p198_p13 = por %p197_p12, %p196_p11 }
  0x22   :  { %p199_p0 = pnand %p198_p13, %p192_p10 }
  0x23   :  { %139 = vmatmul.mubr.msk.bf16.vlgmr.msra.gmra.mxu0 %vm66_vm1, %v42_v3 }
  0xe3   :  { %v104_v5 = vpop.f32.mrf.mxu0 }
  0xe4   :  { %v105_v6 = vadd.f32 %v127_v4, %v104_v5 }
  0xe5   :  { %v140_v7 = vpop.f32.mrf.mxu0 }
  0xe6   :  { %110 = vst [vmem:[#allocation7] sm:$0xff] %v105_v6 }
  0xe7   :  { %v107_v8 = vpop.f32.mrf.mxu0 }
  0xe8   :  { %202 = shalt.err (!%p199_p0)
}
  0xe9   :  { %120 = dma.vmem_to_hbm [thread:$0]  %s118_s25, 128, %s259_s3, [#allocation4]   ;;  %v141_v9 = vpop.f32.mrf.mxu0 }
  0xea   :  { %215 = dma.done.wait [#allocation4], 128  }
  0xeb   :  { %216 = vsyncadd [#allocation4], 4294967168 }
  0xec   :  { %124 = vsyncpa [#allocation3], 1 }
  0xed   :  { %125 = vsyncpa [#allocation6], 1 }
  0xee   :  { %126 = vsyncpa [#allocation4], 1 }

</bundles_post_ra>
